<compile_context>
chip_gen: v5e
topology: v5e:2x2
jax: 0.10.0
libtpu: 0.0.40
codegen_flags: <defaults>
</compile_context>

<pallas_src>
import numpy as np
import jax
import jax.numpy as jnp
from jax import lax
from jax.experimental import pallas as pl
from jax.experimental.pallas import tpu as pltpu

# ----------------------------- config ---------------------------------------
CHANNELS = 2          # `channels`
TIMESTAMPS = 128      # `timeStamps`
EMBEDDING = 2         # `embeddingSize` -> channel_mult
NBATCH = 8            # batch size (full sublane group)
CM = EMBEDDING
EPS = 1e-5            # BatchNorm1d eps
NEG_SLOPE = 0.2       # LeakyReLU negative slope

SEG = 128             # lane-aligned segment width (padded per-layer feature width)
OUT_W = 4 * SEG


def _conv_out_len(l_in, k, s, p):
    return (l_in + 2 * p - k) // s + 1


L0 = TIMESTAMPS
L1 = _conv_out_len(L0, 16, 4, 2)   # Conv1d(channels -> cm*1, k=16, s=4, p=2)
L2 = _conv_out_len(L1, 8, 2, 1)    # Conv1d(cm*1 -> cm*2,  k=8,  s=2, p=1)
L3 = _conv_out_len(L2, 4, 2, 1)    # Conv1d(cm*2 -> cm*4,  k=4,  s=2, p=1)
L4 = _conv_out_len(L3, 4, 1, 1)    # Conv1d(cm*4 -> cm*8,  k=4,  s=1, p=1)

C1, C2, C3, C4 = CM * 1, CM * 2, CM * 4, CM * 8
WIDTHS = (C1 * L1, C2 * L2, C3 * L3, C4 * L4)     # 60, 52, 48, 80 (all <= 128)
OFFS = (0, SEG, 2 * SEG, 3 * SEG)
assert all(w <= SEG for w in WIDTHS)
K0 = CHANNELS * L0                                 # 256, layer-1 contraction dim
assert K0 % 8 == 0


# ----------------------------- Pallas kernel --------------------------------
def encoder_kernel(x_ref, m1_ref, m234_ref, p_ref, o_ref):
    """Whole encoder forward on one TensorCore (all operands resident in VMEM).

    x_ref    : (8, 256)        flattened input (c*L0 layout)
    m1_ref   : (256, 128)      dense Conv1 matrix, cols zero-padded 60->128
    m234_ref : (3, 128, 128)   dense Conv2..4 matrices, rows/cols zero-padded to 128
    p_ref    : (4, 128, 128)   fused BN pooling matrices  P_l = S_l S_l^T / (N*L_l)
    o_ref    : (8, 512)        four lane-aligned (8,128) activation segments
    """

    def bn_lrelu(y, p):
        # Training-mode BatchNorm1d (gamma=1, beta=0) + LeakyReLU(0.2).
        # Per-channel mean / mean-square via ONE MXU dot against the fused pool matrix.
        col_sum = jnp.sum(y, axis=0, keepdims=True)            # (1, 128)
        sq_sum = jnp.sum(y * y, axis=0, keepdims=True)         # (1, 128)
        stacked = jnp.concatenate([col_sum, sq_sum], axis=0)   # (2, 128)
        stats = jnp.dot(stacked, p, preferred_element_type=jnp.float32)  # (2, 128)
        mean = stats[0:1, :]
        msq = stats[1:2, :]
        var = jnp.maximum(msq - mean * mean, 0.0)               # guard cancellation
        yn = (y - mean) * lax.rsqrt(var + EPS)
        return jnp.where(yn >= 0.0, yn, NEG_SLOPE * yn)

    h = x_ref[...]                                               # (8, 256)
    # layer 1: dense Conv1d + BN + LeakyReLU   (conv bias cancelled by BN)
    h = bn_lrelu(jnp.dot(h, m1_ref[...], preferred_element_type=jnp.float32), p_ref[0])
    o_ref[:, 0 * SEG:1 * SEG] = h                                # full 128-lane store
    # layer 2
    h = bn_lrelu(jnp.dot(h, m234_ref[0], preferred_element_type=jnp.float32), p_ref[1])
    o_ref[:, 1 * SEG:2 * SEG] = h
    # layer 3
    h = bn_lrelu(jnp.dot(h, m234_ref[1], preferred_element_type=jnp.float32), p_ref[2])
    o_ref[:, 2 * SEG:3 * SEG] = h
    # layer 4
    h = bn_lrelu(jnp.dot(h, m234_ref[2], preferred_element_type=jnp.float32), p_ref[3])
    o_ref[:, 3 * SEG:4 * SEG] = h


# ----------------------------- glue / parameter setup -----------------------
def _conv1d_dense_padded(W, l_in, stride, padding, l_out, rows_pad, cols_pad):
    """Dense, zero-padded matrix form of Conv1d on the flattened (C*L) layout.

    W: (C_out, C_in, K)  (PyTorch Conv1d weight layout)
    Returns M: (rows_pad, cols_pad) with M[:c_in*l_in, :c_out*l_out] the conv operator,
    zeros elsewhere, so that  y_flat_padded = x_flat_padded @ M.
    """
    W = np.asarray(W, dtype=np.float32)
    c_out, c_in, k = W.shape
    M = np.zeros((rows_pad, cols_pad), dtype=np.float32)
    for o in range(l_out):
        for kk in range(k):
            i = o * stride - padding + kk
            if 0 <= i < l_in:
                rows = np.arange(c_in) * l_in + i
                cols = np.arange(c_out) * l_out + o
                M[np.ix_(rows, cols)] += W[:, :, kk].T
    return M


def _bn_pool_matrix(c, l, n, pad=SEG):
    """Fused BN pooling matrix P = S S^T / (n*l), zero-padded to (pad, pad).

    S[c0*l + i, c0] = 1 is the channel-indicator.  Zero rows/cols for padded lanes keep
    padded activations exactly zero through BN.
    """
    S = np.repeat(np.eye(c, dtype=np.float32), l, axis=0)      # (c*l, c)
    P = (S @ S.T) / float(n * l)                               # (c*l, c*l)
    Pp = np.zeros((pad, pad), dtype=np.float32)
    Pp[:c * l, :c * l] = P
    return Pp


def make_params(key):
    ks = jax.random.split(key, 8)
    scale = 0.1
    # Conv1d weights (C_out, C_in, K) and biases (C_out,)
    w1 = jax.random.normal(ks[0], (C1, CHANNELS, 16), jnp.float32) * scale
    b1 = jax.random.normal(ks[1], (C1,), jnp.float32) * scale
    w2 = jax.random.normal(ks[2], (C2, C1, 8), jnp.float32) * scale
    b2 = jax.random.normal(ks[3], (C2,), jnp.float32) * scale
    w3 = jax.random.normal(ks[4], (C3, C2, 4), jnp.float32) * scale
    b3 = jax.random.normal(ks[5], (C3,), jnp.float32) * scale
    w4 = jax.random.normal(ks[6], (C4, C3, 4), jnp.float32) * scale
    b4 = jax.random.normal(ks[7], (C4,), jnp.float32) * scale
    torch_params = (w1, b1, w2, b2, w3, b3, w4, b4)

    m1 = _conv1d_dense_padded(np.asarray(w1), L0, 4, 2, L1, K0, SEG)        # (256, 128)
    m2 = _conv1d_dense_padded(np.asarray(w2), L1, 2, 1, L2, SEG, SEG)       # (128, 128)
    m3 = _conv1d_dense_padded(np.asarray(w3), L2, 2, 1, L3, SEG, SEG)
    m4 = _conv1d_dense_padded(np.asarray(w4), L3, 1, 1, L4, SEG, SEG)
    m234 = np.stack([m2, m3, m4], axis=0)                                   # (3, 128, 128)

    p_all = np.stack([_bn_pool_matrix(C1, L1, NBATCH),
                      _bn_pool_matrix(C2, L2, NBATCH),
                      _bn_pool_matrix(C3, L3, NBATCH),
                      _bn_pool_matrix(C4, L4, NBATCH)], axis=0)             # (4, 128, 128)

    # NOTE: conv biases are intentionally not given to the kernel — they are exactly
    # cancelled by the training-mode BatchNorm mean subtraction (the reference keeps them).
    kernel_params = (jnp.asarray(m1), jnp.asarray(m234), jnp.asarray(p_all))
    return kernel_params, torch_params


def _cost_estimate():
    dot_flops = 2 * NBATCH * (K0 * SEG + 3 * SEG * SEG)          # conv dots
    bn_flops = 4 * (2 * 2 * SEG * SEG)                            # fused stats dots
    vpu_flops = 4 * (8 * NBATCH * SEG)                            # sums / normalize / lrelu
    bytes_accessed = 4 * (NBATCH * K0 + K0 * SEG + 3 * SEG * SEG
                          + 4 * SEG * SEG + NBATCH * OUT_W)
    return pl.CostEstimate(flops=dot_flops + bn_flops + vpu_flops,
                           transcendentals=4 * SEG,               # rsqrt per lane per layer
                           bytes_accessed=bytes_accessed)


def cnn_encoder_forward(x, kernel_params):
    """x: (N, channels, timeStamps) float32 -> (x_out, [a1, a2, a3, a4])."""
    m1, m234, p_all = kernel_params
    x_flat = x.reshape(NBATCH, -1).astype(jnp.float32)            # (8, 256)
    out_flat = pl.pallas_call(
        encoder_kernel,
        out_shape=jax.ShapeDtypeStruct((NBATCH, OUT_W), jnp.float32),
        in_specs=[pl.BlockSpec(memory_space=pltpu.MemorySpace.VMEM)] * 4,
        out_specs=pl.BlockSpec(memory_space=pltpu.MemorySpace.VMEM),
        cost_estimate=_cost_estimate(),
    )(x_flat, m1, m234, p_all)

    dims = ((C1, L1), (C2, L2), (C3, L3), (C4, L4))
    acts = []
    for (c, l), off, w in zip(dims, OFFS, WIDTHS):
        acts.append(out_flat[:, off:off + w].reshape(NBATCH, c, l))
    return acts[-1], acts


# ----------------------------- plain-JAX reference --------------------------
def reference_forward(x, torch_params):
    (w1, b1, w2, b2, w3, b3, w4, b4) = torch_params

    def conv1d(h, w, b, stride, padding):
        y = lax.conv_general_dilated(
            h, w, window_strides=(stride,), padding=[(padding, padding)],
            dimension_numbers=("NCH", "OIH", "NCH"))
        return y + b[None, :, None]

    def bn_lrelu(y):
        mean = y.mean(axis=(0, 2), keepdims=True)
        var = ((y - mean) ** 2).mean(axis=(0, 2), keepdims=True)   # biased var (training mode)
        yn = (y - mean) / jnp.sqrt(var + EPS)
        return jnp.where(yn >= 0.0, yn, NEG_SLOPE * yn)

    acts = []
    h = x.astype(jnp.float32)
    h = bn_lrelu(conv1d(h, w1, b1, 4, 2)); acts.append(h)
    h = bn_lrelu(conv1d(h, w2, b2, 2, 1)); acts.append(h)
    h = bn_lrelu(conv1d(h, w3, b3, 2, 1)); acts.append(h)
    h = bn_lrelu(conv1d(h, w4, b4, 1, 1)); acts.append(h)
    return h, acts


# ----------------------------- main ------------------------------------------
if __name__ == "__main__":
    key = jax.random.PRNGKey(0)
    k_x, k_p = jax.random.split(key)
    x = jax.random.normal(k_x, (NBATCH, CHANNELS, TIMESTAMPS), jnp.float32)
    kernel_params, torch_params = make_params(k_p)

    x_out, acts = cnn_encoder_forward(x, kernel_params)
    x_out = jax.block_until_ready(x_out)

    x_ref, acts_ref = reference_forward(x, torch_params)

    assert x_out.shape == (NBATCH, C4, L4)
    assert len(acts) == 4
    for a, (c, l) in zip(acts, ((C1, L1), (C2, L2), (C3, L3), (C4, L4))):
        assert a.shape == (NBATCH, c, l)
        assert bool(jnp.all(jnp.isfinite(a)))
    for a, r in zip(acts, acts_ref):
        assert bool(jnp.allclose(a, r, atol=1e-4, rtol=1e-4)), "kernel/reference mismatch"
    assert bool(jnp.allclose(x_out, x_ref, atol=1e-4, rtol=1e-4))
    print("KERNEL_OK")
</pallas_src>

<mosaic_0001>
module attributes {stable_mosaic.version = 11 : i64} {
  func.func @encoder_kernel(%arg0: memref<8x256xf32, #tpu.memory_space<vmem>>, %arg1: memref<256x128xf32, #tpu.memory_space<vmem>>, %arg2: memref<3x128x128xf32, #tpu.memory_space<vmem>>, %arg3: memref<4x128x128xf32, #tpu.memory_space<vmem>>, %arg4: memref<8x512xf32, #tpu.memory_space<vmem>>) attributes {dimension_semantics = [], scalar_prefetch = 0 : i64, scratch_operands = 0 : i64, tpu.core_type = #tpu.core_type<tc>} {
    %c0 = arith.constant 0 : index
    %c0_0 = arith.constant 0 : index
    %0 = vector.load %arg0[%c0, %c0_0] : memref<8x256xf32, #tpu.memory_space<vmem>>, vector<8x256xf32>
    %c0_1 = arith.constant 0 : index
    %c0_2 = arith.constant 0 : index
    %1 = vector.load %arg1[%c0_1, %c0_2] : memref<256x128xf32, #tpu.memory_space<vmem>>, vector<256x128xf32>
    %cst = arith.constant dense<0.000000e+00> : vector<8x128xf32>
    %2 = tpu.matmul %0, %1, %cst {dimension_numbers = #tpu.dot_dimension_numbers<[1], [0], [0], [1], [0, 0, 1, 1], [], []>} : vector<8x256xf32>, vector<256x128xf32>, vector<8x128xf32> -> vector<8x128xf32>
    %c0_3 = arith.constant 0 : index
    %c0_4 = arith.constant 0 : index
    %c0_5 = arith.constant 0 : index
    %3 = vector.load %arg3[%c0_3, %c0_4, %c0_5] : memref<4x128x128xf32, #tpu.memory_space<vmem>>, vector<1x128x128xf32>
    %4 = vector.shape_cast %3 : vector<1x128x128xf32> to vector<128x128xf32>
    %cst_6 = arith.constant dense<0.000000e+00> : vector<128xf32>
    %5 = vector.multi_reduction <add>, %2, %cst_6 [0] : vector<8x128xf32> to vector<128xf32>
    %6 = vector.shape_cast %5 : vector<128xf32> to vector<1x128xf32>
    %7 = arith.mulf %2, %2 : vector<8x128xf32>
    %cst_7 = arith.constant dense<0.000000e+00> : vector<128xf32>
    %8 = vector.multi_reduction <add>, %7, %cst_7 [0] : vector<8x128xf32> to vector<128xf32>
    %9 = vector.shape_cast %8 : vector<128xf32> to vector<1x128xf32>
    %10 = tpu.concatenate %6, %9 in 0 : vector<1x128xf32>, vector<1x128xf32> -> vector<2x128xf32>
    %cst_8 = arith.constant dense<0.000000e+00> : vector<2x128xf32>
    %11 = tpu.matmul %10, %4, %cst_8 {dimension_numbers = #tpu.dot_dimension_numbers<[1], [0], [0], [1], [0, 0, 1, 1], [], []>} : vector<2x128xf32>, vector<128x128xf32>, vector<2x128xf32> -> vector<2x128xf32>
    %12 = vector.extract_strided_slice %11 {offsets = [0, 0], sizes = [1, 128], strides = [1, 1]} : vector<2x128xf32> to vector<1x128xf32>
    %13 = vector.extract_strided_slice %11 {offsets = [1, 0], sizes = [1, 128], strides = [1, 1]} : vector<2x128xf32> to vector<1x128xf32>
    %14 = arith.mulf %12, %12 : vector<1x128xf32>
    %15 = arith.subf %13, %14 : vector<1x128xf32>
    %cst_9 = arith.constant 0.000000e+00 : f32
    %16 = vector.broadcast %cst_9 : f32 to vector<1x128xf32>
    %17 = arith.maximumf %15, %16 : vector<1x128xf32>
    %18 = vector.broadcast %12 : vector<1x128xf32> to vector<8x128xf32>
    %19 = arith.subf %2, %18 : vector<8x128xf32>
    %cst_10 = arith.constant 9.99999974E-6 : f32
    %20 = vector.broadcast %cst_10 : f32 to vector<1x128xf32>
    %21 = arith.addf %17, %20 : vector<1x128xf32>
    %22 = math.rsqrt %21 : vector<1x128xf32>
    %23 = vector.broadcast %22 : vector<1x128xf32> to vector<8x128xf32>
    %24 = arith.mulf %19, %23 : vector<8x128xf32>
    %cst_11 = arith.constant 0.000000e+00 : f32
    %25 = vector.broadcast %cst_11 : f32 to vector<8x128xf32>
    %26 = arith.cmpf oge, %24, %25 : vector<8x128xf32>
    %cst_12 = arith.constant 2.000000e-01 : f32
    %27 = vector.broadcast %cst_12 : f32 to vector<8x128xf32>
    %28 = arith.mulf %27, %24 : vector<8x128xf32>
    %29 = arith.select %26, %24, %28 : vector<8x128xi1>, vector<8x128xf32>
    %c0_13 = arith.constant 0 : index
    %c0_14 = arith.constant 0 : index
    %30 = vector.load %arg4[%c0_13, %c0_14] : memref<8x512xf32, #tpu.memory_space<vmem>>, vector<8x128xf32>
    tpu.vector_store %arg4[%c0_13, %c0_14], %29 {strides = array<i32>} : memref<8x512xf32, #tpu.memory_space<vmem>>, vector<8x128xf32>,
    %c0_15 = arith.constant 0 : index
    %c0_16 = arith.constant 0 : index
    %c0_17 = arith.constant 0 : index
    %31 = vector.load %arg2[%c0_15, %c0_16, %c0_17] : memref<3x128x128xf32, #tpu.memory_space<vmem>>, vector<1x128x128xf32>
    %32 = vector.shape_cast %31 : vector<1x128x128xf32> to vector<128x128xf32>
    %cst_18 = arith.constant dense<0.000000e+00> : vector<8x128xf32>
    %33 = tpu.matmul %29, %32, %cst_18 {dimension_numbers = #tpu.dot_dimension_numbers<[1], [0], [0], [1], [0, 0, 1, 1], [], []>} : vector<8x128xf32>, vector<128x128xf32>, vector<8x128xf32> -> vector<8x128xf32>
    %c1 = arith.constant 1 : index
    %c0_19 = arith.constant 0 : index
    %c0_20 = arith.constant 0 : index
    %34 = vector.load %arg3[%c1, %c0_19, %c0_20] : memref<4x128x128xf32, #tpu.memory_space<vmem>>, vector<1x128x128xf32>
    %35 = vector.shape_cast %34 : vector<1x128x128xf32> to vector<128x128xf32>
    %cst_21 = arith.constant dense<0.000000e+00> : vector<128xf32>
    %36 = vector.multi_reduction <add>, %33, %cst_21 [0] : vector<8x128xf32> to vector<128xf32>
    %37 = vector.shape_cast %36 : vector<128xf32> to vector<1x128xf32>
    %38 = arith.mulf %33, %33 : vector<8x128xf32>
    %cst_22 = arith.constant dense<0.000000e+00> : vector<128xf32>
    %39 = vector.multi_reduction <add>, %38, %cst_22 [0] : vector<8x128xf32> to vector<128xf32>
    %40 = vector.shape_cast %39 : vector<128xf32> to vector<1x128xf32>
    %41 = tpu.concatenate %37, %40 in 0 : vector<1x128xf32>, vector<1x128xf32> -> vector<2x128xf32>
    %cst_23 = arith.constant dense<0.000000e+00> : vector<2x128xf32>
    %42 = tpu.matmul %41, %35, %cst_23 {dimension_numbers = #tpu.dot_dimension_numbers<[1], [0], [0], [1], [0, 0, 1, 1], [], []>} : vector<2x128xf32>, vector<128x128xf32>, vector<2x128xf32> -> vector<2x128xf32>
    %43 = vector.extract_strided_slice %42 {offsets = [0, 0], sizes = [1, 128], strides = [1, 1]} : vector<2x128xf32> to vector<1x128xf32>
    %44 = vector.extract_strided_slice %42 {offsets = [1, 0], sizes = [1, 128], strides = [1, 1]} : vector<2x128xf32> to vector<1x128xf32>
    %45 = arith.mulf %43, %43 : vector<1x128xf32>
    %46 = arith.subf %44, %45 : vector<1x128xf32>
    %cst_24 = arith.constant 0.000000e+00 : f32
    %47 = vector.broadcast %cst_24 : f32 to vector<1x128xf32>
    %48 = arith.maximumf %46, %47 : vector<1x128xf32>
    %49 = vector.broadcast %43 : vector<1x128xf32> to vector<8x128xf32>
    %50 = arith.subf %33, %49 : vector<8x128xf32>
    %cst_25 = arith.constant 9.99999974E-6 : f32
    %51 = vector.broadcast %cst_25 : f32 to vector<1x128xf32>
    %52 = arith.addf %48, %51 : vector<1x128xf32>
    %53 = math.rsqrt %52 : vector<1x128xf32>
    %54 = vector.broadcast %53 : vector<1x128xf32> to vector<8x128xf32>
    %55 = arith.mulf %50, %54 : vector<8x128xf32>
    %cst_26 = arith.constant 0.000000e+00 : f32
    %56 = vector.broadcast %cst_26 : f32 to vector<8x128xf32>
    %57 = arith.cmpf oge, %55, %56 : vector<8x128xf32>
    %cst_27 = arith.constant 2.000000e-01 : f32
    %58 = vector.broadcast %cst_27 : f32 to vector<8x128xf32>
    %59 = arith.mulf %58, %55 : vector<8x128xf32>
    %60 = arith.select %57, %55, %59 : vector<8x128xi1>, vector<8x128xf32>
    %c0_28 = arith.constant 0 : index
    %c128 = arith.constant 128 : index
    %61 = vector.load %arg4[%c0_28, %c128] : memref<8x512xf32, #tpu.memory_space<vmem>>, vector<8x128xf32>
    tpu.vector_store %arg4[%c0_28, %c128], %60 {strides = array<i32>} : memref<8x512xf32, #tpu.memory_space<vmem>>, vector<8x128xf32>,
    %c1_29 = arith.constant 1 : index
    %c0_30 = arith.constant 0 : index
    %c0_31 = arith.constant 0 : index
    %62 = vector.load %arg2[%c1_29, %c0_30, %c0_31] : memref<3x128x128xf32, #tpu.memory_space<vmem>>, vector<1x128x128xf32>
    %63 = vector.shape_cast %62 : vector<1x128x128xf32> to vector<128x128xf32>
    %cst_32 = arith.constant dense<0.000000e+00> : vector<8x128xf32>
    %64 = tpu.matmul %60, %63, %cst_32 {dimension_numbers = #tpu.dot_dimension_numbers<[1], [0], [0], [1], [0, 0, 1, 1], [], []>} : vector<8x128xf32>, vector<128x128xf32>, vector<8x128xf32> -> vector<8x128xf32>
    %c2 = arith.constant 2 : index
    %c0_33 = arith.constant 0 : index
    %c0_34 = arith.constant 0 : index
    %65 = vector.load %arg3[%c2, %c0_33, %c0_34] : memref<4x128x128xf32, #tpu.memory_space<vmem>>, vector<1x128x128xf32>
    %66 = vector.shape_cast %65 : vector<1x128x128xf32> to vector<128x128xf32>
    %cst_35 = arith.constant dense<0.000000e+00> : vector<128xf32>
    %67 = vector.multi_reduction <add>, %64, %cst_35 [0] : vector<8x128xf32> to vector<128xf32>
    %68 = vector.shape_cast %67 : vector<128xf32> to vector<1x128xf32>
    %69 = arith.mulf %64, %64 : vector<8x128xf32>
    %cst_36 = arith.constant dense<0.000000e+00> : vector<128xf32>
    %70 = vector.multi_reduction <add>, %69, %cst_36 [0] : vector<8x128xf32> to vector<128xf32>
    %71 = vector.shape_cast %70 : vector<128xf32> to vector<1x128xf32>
    %72 = tpu.concatenate %68, %71 in 0 : vector<1x128xf32>, vector<1x128xf32> -> vector<2x128xf32>
    %cst_37 = arith.constant dense<0.000000e+00> : vector<2x128xf32>
    %73 = tpu.matmul %72, %66, %cst_37 {dimension_numbers = #tpu.dot_dimension_numbers<[1], [0], [0], [1], [0, 0, 1, 1], [], []>} : vector<2x128xf32>, vector<128x128xf32>, vector<2x128xf32> -> vector<2x128xf32>
    %74 = vector.extract_strided_slice %73 {offsets = [0, 0], sizes = [1, 128], strides = [1, 1]} : vector<2x128xf32> to vector<1x128xf32>
    %75 = vector.extract_strided_slice %73 {offsets = [1, 0], sizes = [1, 128], strides = [1, 1]} : vector<2x128xf32> to vector<1x128xf32>
    %76 = arith.mulf %74, %74 : vector<1x128xf32>
    %77 = arith.subf %75, %76 : vector<1x128xf32>
    %cst_38 = arith.constant 0.000000e+00 : f32
    %78 = vector.broadcast %cst_38 : f32 to vector<1x128xf32>
    %79 = arith.maximumf %77, %78 : vector<1x128xf32>
    %80 = vector.broadcast %74 : vector<1x128xf32> to vector<8x128xf32>
    %81 = arith.subf %64, %80 : vector<8x128xf32>
    %cst_39 = arith.constant 9.99999974E-6 : f32
    %82 = vector.broadcast %cst_39 : f32 to vector<1x128xf32>
    %83 = arith.addf %79, %82 : vector<1x128xf32>
    %84 = math.rsqrt %83 : vector<1x128xf32>
    %85 = vector.broadcast %84 : vector<1x128xf32> to vector<8x128xf32>
    %86 = arith.mulf %81, %85 : vector<8x128xf32>
    %cst_40 = arith.constant 0.000000e+00 : f32
    %87 = vector.broadcast %cst_40 : f32 to vector<8x128xf32>
    %88 = arith.cmpf oge, %86, %87 : vector<8x128xf32>
    %cst_41 = arith.constant 2.000000e-01 : f32
    %89 = vector.broadcast %cst_41 : f32 to vector<8x128xf32>
    %90 = arith.mulf %89, %86 : vector<8x128xf32>
    %91 = arith.select %88, %86, %90 : vector<8x128xi1>, vector<8x128xf32>
    %c0_42 = arith.constant 0 : index
    %c256 = arith.constant 256 : index
    %92 = vector.load %arg4[%c0_42, %c256] : memref<8x512xf32, #tpu.memory_space<vmem>>, vector<8x128xf32>
    tpu.vector_store %arg4[%c0_42, %c256], %91 {strides = array<i32>} : memref<8x512xf32, #tpu.memory_space<vmem>>, vector<8x128xf32>,
    %c2_43 = arith.constant 2 : index
    %c0_44 = arith.constant 0 : index
    %c0_45 = arith.constant 0 : index
    %93 = vector.load %arg2[%c2_43, %c0_44, %c0_45] : memref<3x128x128xf32, #tpu.memory_space<vmem>>, vector<1x128x128xf32>
    %94 = vector.shape_cast %93 : vector<1x128x128xf32> to vector<128x128xf32>
    %cst_46 = arith.constant dense<0.000000e+00> : vector<8x128xf32>
    %95 = tpu.matmul %91, %94, %cst_46 {dimension_numbers = #tpu.dot_dimension_numbers<[1], [0], [0], [1], [0, 0, 1, 1], [], []>} : vector<8x128xf32>, vector<128x128xf32>, vector<8x128xf32> -> vector<8x128xf32>
    %c3 = arith.constant 3 : index
    %c0_47 = arith.constant 0 : index
    %c0_48 = arith.constant 0 : index
    %96 = vector.load %arg3[%c3, %c0_47, %c0_48] : memref<4x128x128xf32, #tpu.memory_space<vmem>>, vector<1x128x128xf32>
    %97 = vector.shape_cast %96 : vector<1x128x128xf32> to vector<128x128xf32>
    %cst_49 = arith.constant dense<0.000000e+00> : vector<128xf32>
    %98 = vector.multi_reduction <add>, %95, %cst_49 [0] : vector<8x128xf32> to vector<128xf32>
    %99 = vector.shape_cast %98 : vector<128xf32> to vector<1x128xf32>
    %100 = arith.mulf %95, %95 : vector<8x128xf32>
    %cst_50 = arith.constant dense<0.000000e+00> : vector<128xf32>
    %101 = vector.multi_reduction <add>, %100, %cst_50 [0] : vector<8x128xf32> to vector<128xf32>
    %102 = vector.shape_cast %101 : vector<128xf32> to vector<1x128xf32>
    %103 = tpu.concatenate %99, %102 in 0 : vector<1x128xf32>, vector<1x128xf32> -> vector<2x128xf32>
    %cst_51 = arith.constant dense<0.000000e+00> : vector<2x128xf32>
    %104 = tpu.matmul %103, %97, %cst_51 {dimension_numbers = #tpu.dot_dimension_numbers<[1], [0], [0], [1], [0, 0, 1, 1], [], []>} : vector<2x128xf32>, vector<128x128xf32>, vector<2x128xf32> -> vector<2x128xf32>
    %105 = vector.extract_strided_slice %104 {offsets = [0, 0], sizes = [1, 128], strides = [1, 1]} : vector<2x128xf32> to vector<1x128xf32>
    %106 = vector.extract_strided_slice %104 {offsets = [1, 0], sizes = [1, 128], strides = [1, 1]} : vector<2x128xf32> to vector<1x128xf32>
    %107 = arith.mulf %105, %105 : vector<1x128xf32>
    %108 = arith.subf %106, %107 : vector<1x128xf32>
    %cst_52 = arith.constant 0.000000e+00 : f32
    %109 = vector.broadcast %cst_52 : f32 to vector<1x128xf32>
    %110 = arith.maximumf %108, %109 : vector<1x128xf32>
    %111 = vector.broadcast %105 : vector<1x128xf32> to vector<8x128xf32>
    %112 = arith.subf %95, %111 : vector<8x128xf32>
    %cst_53 = arith.constant 9.99999974E-6 : f32
    %113 = vector.broadcast %cst_53 : f32 to vector<1x128xf32>
    %114 = arith.addf %110, %113 : vector<1x128xf32>
    %115 = math.rsqrt %114 : vector<1x128xf32>
    %116 = vector.broadcast %115 : vector<1x128xf32> to vector<8x128xf32>
    %117 = arith.mulf %112, %116 : vector<8x128xf32>
    %cst_54 = arith.constant 0.000000e+00 : f32
    %118 = vector.broadcast %cst_54 : f32 to vector<8x128xf32>
    %119 = arith.cmpf oge, %117, %118 : vector<8x128xf32>
    %cst_55 = arith.constant 2.000000e-01 : f32
    %120 = vector.broadcast %cst_55 : f32 to vector<8x128xf32>
    %121 = arith.mulf %120, %117 : vector<8x128xf32>
    %122 = arith.select %119, %117, %121 : vector<8x128xi1>, vector<8x128xf32>
    %c0_56 = arith.constant 0 : index
    %c384 = arith.constant 384 : index
    %123 = vector.load %arg4[%c0_56, %c384] : memref<8x512xf32, #tpu.memory_space<vmem>>, vector<8x128xf32>
    tpu.vector_store %arg4[%c0_56, %c384], %122 {strides = array<i32>} : memref<8x512xf32, #tpu.memory_space<vmem>>, vector<8x128xf32>,
    return
  }
}

</mosaic_0001>

<bundles_post_ra>
// kernel: tpu_custom_call.1
= control target key start
LH: loop header
LB: loop body
LE: loop exit
PB: predicated region body
PF: predicated region fallthrough
CT: control target
= control target key end

     0   :  { %9 = vsyncpa [#allocation3], 0  ;;  %s801_s0 = inlined_call_operand.hbm [shape: f32[8,256], index: 0, kind: input, shape index: {}]   ;;  %s802_s1 = inlined_call_operand.hbm [shape: f32[256,128], index: 1, kind: input, shape index: {}]   ;;  %s803_s2 = inlined_call_operand.hbm [shape: f32[3,128,128], index: 2, kind: input, shape index: {}]   ;;  %s804_s3 = inlined_call_operand.hbm [shape: f32[4,128,128], index: 3, kind: input, shape index: {}]   ;;  %s805_s4 = inlined_call_operand.hbm [shape: f32[8,512], index: 4, kind: output, shape index: {}]  }
   0x1   :  { %10 = vsyncpa [#allocation6], 0 }
   0x2   :  { %11 = vsyncpa [#allocation9], 0  ;;  %s28_s17 = sshll.u32 %s802_s1, 4  ;;  %s29_s17 = int_to_ptr.hbm [resolvable:$true] %s28_s17 }
   0x3   :  { %12 = vsyncpa [#allocation4], 0  ;;  %s729_s18 = smov [#allocation5]   ;;  %s18_s22 = sshll.u32 %s801_s0, 4  ;;  %s19_s22 = int_to_ptr.hbm [resolvable:$true] %s18_s22 }
   0x4   :  { %s30_s19 = sshll.u32 %s729_s18, 4  ;;  %s730_s23 = smov 128   ;;  %s31_s19 = int_to_ptr.vmem [resolvable:$true] %s30_s19 }
   0x5   :  { %s731_s24 = smov 8   ;;  %s732_s25 = smov [#allocation2]  }
   0x6   :  { %36 = dma.hbm_to_vmem [thread:$0]  %s29_s17, 4096, %s31_s19, [#allocation6], %s730_s23, %s730_s23, %s731_s24  }
   0x7   :  { %s20_s26 = sshll.u32 %s732_s25, 4  ;;  %s41_s29 = sshll.u32 %s803_s2, 4  ;;  %s21_s26 = int_to_ptr.vmem [resolvable:$true] %s20_s26  ;;  %s42_s29 = int_to_ptr.hbm [resolvable:$true] %s41_s29 }
   0x8   :  { %23 = dma.hbm_to_vmem [thread:$0]  %s19_s22, 256, %s21_s26, [#allocation3]  }
   0x9   :  { %s54_s5 = sshll.u32 %s804_s3, 4  ;;  %s733_s6 = smov [#allocation7]   ;;  %s55_s5 = int_to_ptr.hbm [resolvable:$true] %s54_s5 }
   0xa   :  { %s43_s7 = sshll.u32 %s733_s6, 4  ;;  %s734_s0 = smov [#allocation8]   ;;  %s44_s7 = int_to_ptr.vmem [resolvable:$true] %s43_s7 }
   0xb   :  { %49 = dma.hbm_to_vmem [thread:$0]  %s42_s29, 6144, %s44_s7, [#allocation6], %s730_s23, %s730_s23, %s731_s24  }
   0xc   :  { %s56_s8 = sshll.u32 %s734_s0, 4  ;;  %s57_s8 = int_to_ptr.vmem [resolvable:$true] %s56_s8 }
   0xd   :  { %62 = dma.hbm_to_vmem [thread:$0]  %s55_s5, 8192, %s57_s8, [#allocation9], %s730_s23, %s730_s23, %s731_s24  }
   0xe   :  { %721 = dma.done.wait [#allocation3], 256  }
   0xf   :  { %722 = vsyncadd [#allocation3], 4294967040 }
  0x10   :  { %723 = dma.done.wait [#allocation6], 10240  }
  0x11   :  { %724 = vsyncadd [#allocation6], 4294957056 }
  0x12   :  { %725 = dma.done.wait [#allocation9], 8192  }
  0x13   :  { %726 = vsyncadd [#allocation9], 4294959104  ;;  %v96_v0 = vld [vmem:[#allocation5 + $0x78] sm:$0xff]  ;;  %v95_v2 = vld [vmem:[#allocation5 + $0x70] sm:$0xff]  ;;  %vm182_vm0 = vcmask 1040384   ;;  %s735_s2 = smov [#allocation10]  }
  0x14   :  { %v112_v1 = vld [vmem:[#allocation5 + $0xf8] sm:$0xff]  ;;  %113 = vmatpush.msra.mxu0 %v96_v0  ;;  %v111_v3 = vld [vmem:[#allocation5 + $0xf0] sm:$0xff]  ;;  %v94_v4 = vld [vmem:[#allocation5 + $0x68] sm:$0xff]  ;;  %s572_s3 = sshll.u32 %s735_s2, 4  ;;  %s574_s11 = sshll.u32 %s805_s4, 4  ;;  %s573_s3 = int_to_ptr.vmem [resolvable:$true] %s572_s3  ;;  %s575_s11 = int_to_ptr.hbm [resolvable:$true] %s574_s11 }
  0x15   :  { %133 = vmatpush.msra.mxu1 %v112_v1  ;;  %v110_v5 = vld [vmem:[#allocation5 + $0xe8] sm:$0xff]  ;;  %v93_v6 = vld [vmem:[#allocation5 + $0x60] sm:$0xff]  ;;  %v92_v8 = vld [vmem:[#allocation5 + $0x58] sm:$0xff] }
  0x16   :  { %114 = vmatpush.msra.mxu0 %v95_v2  ;;  %v109_v7 = vld [vmem:[#allocation5 + $0xe0] sm:$0xff]  ;;  %v108_v9 = vld [vmem:[#allocation5 + $0xd8] sm:$0xff]  ;;  %v91_v10 = vld [vmem:[#allocation5 + $0x50] sm:$0xff] }
  0x17   :  { %134 = vmatpush.msra.mxu1 %v111_v3  ;;  %v107_v11 = vld [vmem:[#allocation5 + $0xd0] sm:$0xff]  ;;  %v90_v12 = vld [vmem:[#allocation5 + $0x48] sm:$0xff]  ;;  %v168_v14 = vld [vmem:[#allocation8 + $0x78] sm:$0xff] }
  0x18   :  { %115 = vmatpush.msra.mxu0 %v94_v4  ;;  %v106_v13 = vld [vmem:[#allocation5 + $0xc8] sm:$0xff]  ;;  %v167_v15 = vld [vmem:[#allocation8 + $0x70] sm:$0xff]  ;;  %v89_v16 = vld [vmem:[#allocation5 + $0x40] sm:$0xff]  ;;  %184 = vmatpush.msra.mxu2 %v168_v14 }
  0x19   :  { %135 = vmatpush.msra.mxu1 %v110_v5  ;;  %v105_v17 = vld [vmem:[#allocation5 + $0xc0] sm:$0xff]  ;;  %v166_v18 = vld [vmem:[#allocation8 + $0x68] sm:$0xff]  ;;  %v88_v19 = vld [vmem:[#allocation5 + $0x38] sm:$0xff] }
  0x1a   :  { %116 = vmatpush.msra.mxu0 %v93_v6  ;;  %v104_v20 = vld [vmem:[#allocation5 + $0xb8] sm:$0xff]  ;;  %185 = vmatpush.msra.mxu2 %v167_v15  ;;  %v165_v21 = vld [vmem:[#allocation8 + $0x60] sm:$0xff]  ;;  %v87_v22 = vld [vmem:[#allocation5 + $0x30] sm:$0xff] }
  0x1b   :  { %136 = vmatpush.msra.mxu1 %v109_v7  ;;  %v103_v23 = vld [vmem:[#allocation5 + $0xb0] sm:$0xff]  ;;  %v164_v24 = vld [vmem:[#allocation8 + $0x58] sm:$0xff]  ;;  %v86_v25 = vld [vmem:[#allocation5 + $0x28] sm:$0xff] }
  0x1c   :  { %117 = vmatpush.msra.mxu0 %v92_v8  ;;  %186 = vmatpush.msra.mxu2 %v166_v18  ;;  %v102_v26 = vld [vmem:[#allocation5 + $0xa8] sm:$0xff]  ;;  %v163_v27 = vld [vmem:[#allocation8 + $0x50] sm:$0xff]  ;;  %v85_v28 = vld [vmem:[#allocation5 + $0x20] sm:$0xff] }
  0x1d   :  { %137 = vmatpush.msra.mxu1 %v108_v9  ;;  %v101_v29 = vld [vmem:[#allocation5 + $0xa0] sm:$0xff]  ;;  %v162_v30 = vld [vmem:[#allocation8 + $0x48] sm:$0xff]  ;;  %v84_v31 = vld [vmem:[#allocation5 + $0x18] sm:$0xff] }
  0x1e   :  { %118 = vmatpush.msra.mxu0 %v91_v10  ;;  %187 = vmatpush.msra.mxu2 %v165_v21  ;;  %v100_v32 = vld [vmem:[#allocation5 + $0x98] sm:$0xff]  ;;  %v83_v33 = vld [vmem:[#allocation5 + $0x10] sm:$0xff]  ;;  %v82_v35 = vld [vmem:[#allocation5 + $0x8] sm:$0xff] }
  0x1f   :  { %138 = vmatpush.msra.mxu1 %v107_v11  ;;  %v99_v34 = vld [vmem:[#allocation5 + $0x90] sm:$0xff]  ;;  %v98_v36 = vld [vmem:[#allocation5 + $0x88] sm:$0xff]  ;;  %v81_v37 = vld [vmem:[#allocation5] sm:$0xff] }
  0x20   :  { %119 = vmatpush.msra.mxu0 %v90_v12  ;;  %188 = vmatpush.msra.mxu2 %v164_v24  ;;  %v97_v38 = vld [vmem:[#allocation5 + $0x80] sm:$0xff]  ;;  %v79_v39 = vld [vmem:[#allocation2] sm:$0xff]  ;;  %v80_v40 = vld [vmem:[#allocation2 + $0x8] sm:$0xff] }
  0x21   :  { %139 = vmatpush.msra.mxu1 %v106_v13  ;;  %v161_v41 = vld [vmem:[#allocation8 + $0x40] sm:$0xff]  ;;  %v160_v42 = vld [vmem:[#allocation8 + $0x38] sm:$0xff]  ;;  %v159_v43 = vld [vmem:[#allocation8 + $0x30] sm:$0xff] }
  0x22   :  { %120 = vmatpush.msra.mxu0 %v89_v16  ;;  %189 = vmatpush.msra.mxu2 %v163_v27  ;;  %v158_v44 = vld [vmem:[#allocation8 + $0x28] sm:$0xff]  ;;  %v157_v45 = vld [vmem:[#allocation8 + $0x20] sm:$0xff]  ;;  %v156_v46 = vld [vmem:[#allocation8 + $0x18] sm:$0xff] }
  0x23   :  { %140 = vmatpush.msra.mxu1 %v105_v17  ;;  %v155_v47 = vld [vmem:[#allocation8 + $0x10] sm:$0xff]  ;;  %v154_v48 = vld [vmem:[#allocation8 + $0x8] sm:$0xff]  ;;  %v153_v49 = vld [vmem:[#allocation8] sm:$0xff] }
  0x24   :  { %121 = vmatpush.msra.mxu0 %v88_v19  ;;  %190 = vmatpush.msra.mxu2 %v162_v30  ;;  %v244_v3 = vld [vmem:[#allocation7 + $0x78] sm:$0xff]  ;;  %v243_v4 = vld [vmem:[#allocation7 + $0x70] sm:$0xff]  ;;  %v242_v5 = vld [vmem:[#allocation7 + $0x68] sm:$0xff] }
  0x25   :  { %141 = vmatpush.msra.mxu1 %v104_v20  ;;  %245 = vmatpush.msra.mxu3 %v244_v3  ;;  %v241_v6 = vld [vmem:[#allocation7 + $0x60] sm:$0xff]  ;;  %v240_v7 = vld [vmem:[#allocation7 + $0x58] sm:$0xff]  ;;  %v239_v8 = vld [vmem:[#allocation7 + $0x50] sm:$0xff] }
  0x26   :  { %122 = vmatpush.msra.mxu0 %v87_v22  ;;  %191 = vmatpush.msra.mxu2 %v161_v41  ;;  %v238_v9 = vld [vmem:[#allocation7 + $0x48] sm:$0xff]  ;;  %v237_v10 = vld [vmem:[#allocation7 + $0x40] sm:$0xff]  ;;  %v236_v11 = vld [vmem:[#allocation7 + $0x38] sm:$0xff] }
  0x27   :  { %142 = vmatpush.msra.mxu1 %v103_v23  ;;  %246 = vmatpush.msra.mxu3 %v243_v4  ;;  %v235_v12 = vld [vmem:[#allocation7 + $0x30] sm:$0xff]  ;;  %v234_v13 = vld [vmem:[#allocation7 + $0x28] sm:$0xff]  ;;  %v233_v14 = vld [vmem:[#allocation7 + $0x20] sm:$0xff] }
  0x28   :  { %123 = vmatpush.msra.mxu0 %v86_v25  ;;  %192 = vmatpush.msra.mxu2 %v160_v42  ;;  %v232_v15 = vld [vmem:[#allocation7 + $0x18] sm:$0xff]  ;;  %v231_v16 = vld [vmem:[#allocation7 + $0x10] sm:$0xff]  ;;  %v230_v17 = vld [vmem:[#allocation7 + $0x8] sm:$0xff] }
  0x29   :  { %143 = vmatpush.msra.mxu1 %v102_v26  ;;  %247 = vmatpush.msra.mxu3 %v242_v5  ;;  %v229_v19 = vld [vmem:[#allocation7] sm:$0xff]  ;;  %v281_v22 = vld [vmem:[#allocation8 + $0xf8] sm:$0xff]  ;;  %v280_v23 = vld [vmem:[#allocation8 + $0xf0] sm:$0xff] }
  0x2a   :  { %124 = vmatpush.msra.mxu0 %v85_v28  ;;  %193 = vmatpush.msra.mxu2 %v159_v43  ;;  %v279_v25 = vld [vmem:[#allocation8 + $0xe8] sm:$0xff]  ;;  %v278_v27 = vld [vmem:[#allocation8 + $0xe0] sm:$0xff]  ;;  %v276_v30 = vld [vmem:[#allocation8 + $0xd0] sm:$0xff] }
  0x2b   :  { %144 = vmatpush.msra.mxu1 %v101_v29  ;;  %248 = vmatpush.msra.mxu3 %v241_v6  ;;  %v277_v29 = vld [vmem:[#allocation8 + $0xd8] sm:$0xff]  ;;  %v356_v6 = vld [vmem:[#allocation7 + $0xf0] sm:$0xff] }
  0x2c   :  { %125 = vmatpush.msra.mxu0 %v84_v31  ;;  %194 = vmatpush.msra.mxu2 %v158_v44  ;;  %v275_v31 = vld [vmem:[#allocation8 + $0xc8] sm:$0xff]  ;;  %v357_v5 = vld [vmem:[#allocation7 + $0xf8] sm:$0xff] }
  0x2d   :  { %145 = vmatpush.msra.mxu1 %v100_v32  ;;  %249 = vmatpush.msra.mxu3 %v240_v7  ;;  %v274_v32 = vld [vmem:[#allocation8 + $0xc0] sm:$0xff]  ;;  %v355_v7 = vld [vmem:[#allocation7 + $0xe8] sm:$0xff] }
  0x2e   :  { %126 = vmatpush.msra.mxu0 %v83_v33  ;;  %195 = vmatpush.msra.mxu2 %v157_v45 }
  0x2f   :  { %146 = vmatpush.msra.mxu1 %v99_v34  ;;  %250 = vmatpush.msra.mxu3 %v239_v8  ;;  %v354_v8 = vld [vmem:[#allocation7 + $0xe0] sm:$0xff] }
  0x30   :  { %127 = vmatpush.msra.mxu0 %v82_v35  ;;  %196 = vmatpush.msra.mxu2 %v156_v46  ;;  %v273_v46 = vld [vmem:[#allocation8 + $0xb8] sm:$0xff] }
  0x31   :  { %147 = vmatpush.msra.mxu1 %v98_v36  ;;  %251 = vmatpush.msra.mxu3 %v238_v9  ;;  %v353_v9 = vld [vmem:[#allocation7 + $0xd8] sm:$0xff] }
  0x32   :  { %128 = vmatpush.msra.mxu0 %v81_v37  ;;  %197 = vmatpush.msra.mxu2 %v155_v47  ;;  %v272_v47 = vld [vmem:[#allocation8 + $0xb0] sm:$0xff] }
  0x33   :  { %148 = vmatpush.msra.mxu1 %v97_v38  ;;  %129 = vmatmul.f32.vlgmr.msra.gmra.mxu0 %v79_v39 }
  0x34   :  { %149 = vmatmul.f32.vlgmr.msra.gmra.mxu1 %v80_v40  ;;  %198 = vmatpush.msra.mxu2 %v154_v48  ;;  %v271_v48 = vld [vmem:[#allocation8 + $0xa8] sm:$0xff] }
  0x35   :  { %252 = vmatpush.msra.mxu3 %v237_v10  ;;  %296 = vmatpush.msrb.mxu0 %v281_v22  ;;  %v352_v10 = vld [vmem:[#allocation7 + $0xd0] sm:$0xff] }
  0x36   :  { %199 = vmatpush.msra.mxu2 %v153_v49  ;;  %v270_v49 = vld [vmem:[#allocation8 + $0xa0] sm:$0xff]  ;;  %358 = vmatpush.msrb.mxu1 %v357_v5 }
  0x37   :  { %253 = vmatpush.msra.mxu3 %v236_v11  ;;  %297 = vmatpush.msrb.mxu0 %v280_v23  ;;  %v351_v11 = vld [vmem:[#allocation7 + $0xc8] sm:$0xff] }
  0x38   :  { %359 = vmatpush.msrb.mxu1 %v356_v6 }
  0x39   :  { %254 = vmatpush.msra.mxu3 %v235_v12  ;;  %298 = vmatpush.msrb.mxu0 %v279_v25  ;;  %v350_v12 = vld [vmem:[#allocation7 + $0xc0] sm:$0xff]  ;;  %v393_v25 = vld [vmem:[#allocation8 + $0x170] sm:$0xff] }
  0x3a   :  { %360 = vmatpush.msrb.mxu1 %v355_v7  ;;  %v470_v7 = vld [vmem:[#allocation7 + $0x178] sm:$0xff] }
  0x3b   :  { %255 = vmatpush.msra.mxu3 %v234_v13  ;;  %299 = vmatpush.msrb.mxu0 %v278_v27  ;;  %v349_v13 = vld [vmem:[#allocation7 + $0xb8] sm:$0xff]  ;;  %v392_v27 = vld [vmem:[#allocation8 + $0x168] sm:$0xff] }
  0x3c   :  { %361 = vmatpush.msrb.mxu1 %v354_v8  ;;  %v469_v8 = vld [vmem:[#allocation7 + $0x170] sm:$0xff] }
  0x3d   :  { %256 = vmatpush.msra.mxu3 %v233_v14  ;;  %300 = vmatpush.msrb.mxu0 %v277_v29  ;;  %v348_v14 = vld [vmem:[#allocation7 + $0xb0] sm:$0xff]  ;;  %v391_v29 = vld [vmem:[#allocation8 + $0x160] sm:$0xff] }
  0x3e   :  { %362 = vmatpush.msrb.mxu1 %v353_v9  ;;  %v468_v9 = vld [vmem:[#allocation7 + $0x168] sm:$0xff] }
  0x3f   :  { %257 = vmatpush.msra.mxu3 %v232_v15  ;;  %301 = vmatpush.msrb.mxu0 %v276_v30  ;;  %v347_v15 = vld [vmem:[#allocation7 + $0xa8] sm:$0xff] }
  0x40   :  { %363 = vmatpush.msrb.mxu1 %v352_v10  ;;  %v467_v10 = vld [vmem:[#allocation7 + $0x160] sm:$0xff] }
  0x41   :  { %258 = vmatpush.msra.mxu3 %v231_v16  ;;  %302 = vmatpush.msrb.mxu0 %v275_v31  ;;  %v346_v16 = vld [vmem:[#allocation7 + $0xa0] sm:$0xff]  ;;  %v390_v31 = vld [vmem:[#allocation8 + $0x158] sm:$0xff] }
  0x42   :  { %364 = vmatpush.msrb.mxu1 %v351_v11  ;;  %v466_v11 = vld [vmem:[#allocation7 + $0x158] sm:$0xff] }
  0x43   :  { %259 = vmatpush.msra.mxu3 %v230_v17  ;;  %303 = vmatpush.msrb.mxu0 %v274_v32  ;;  %v345_v17 = vld [vmem:[#allocation7 + $0x98] sm:$0xff]  ;;  %v389_v32 = vld [vmem:[#allocation8 + $0x150] sm:$0xff] }
  0x44   :  { %365 = vmatpush.msrb.mxu1 %v350_v12  ;;  %v465_v12 = vld [vmem:[#allocation7 + $0x150] sm:$0xff] }
  0x45   :  { %260 = vmatpush.msra.mxu3 %v229_v19  ;;  %304 = vmatpush.msrb.mxu0 %v273_v46  ;;  %v343_v19 = vld [vmem:[#allocation7 + $0x88] sm:$0xff] }
  0x46   :  { %366 = vmatpush.msrb.mxu1 %v349_v13  ;;  %v464_v13 = vld [vmem:[#allocation7 + $0x148] sm:$0xff] }
  0x47   :  { %305 = vmatpush.msrb.mxu0 %v272_v47  ;;  %471 = vmatpush.msrb.mxu3 %v470_v7 }
  0x48   :  { %367 = vmatpush.msrb.mxu1 %v348_v14  ;;  %v463_v14 = vld [vmem:[#allocation7 + $0x140] sm:$0xff] }
  0x49   :  { %306 = vmatpush.msrb.mxu0 %v271_v48  ;;  %v386_v48 = vld [vmem:[#allocation8 + $0x138] sm:$0xff]  ;;  %472 = vmatpush.msrb.mxu3 %v469_v8 }
  0x4a   :  { %368 = vmatpush.msrb.mxu1 %v347_v15  ;;  %v462_v15 = vld [vmem:[#allocation7 + $0x138] sm:$0xff] }
  0x4b   :  { %307 = vmatpush.msrb.mxu0 %v270_v49  ;;  %v385_v49 = vld [vmem:[#allocation8 + $0x130] sm:$0xff]  ;;  %473 = vmatpush.msrb.mxu3 %v468_v9 }
  0x4c   :  { %369 = vmatpush.msrb.mxu1 %v346_v16  ;;  %v461_v16 = vld [vmem:[#allocation7 + $0x130] sm:$0xff] }
  0x4d   :  { %474 = vmatpush.msrb.mxu3 %v467_v10 }
  0x4e   :  { %370 = vmatpush.msrb.mxu1 %v345_v17  ;;  %v460_v17 = vld [vmem:[#allocation7 + $0x128] sm:$0xff] }
  0x4f   :  { %475 = vmatpush.msrb.mxu3 %v466_v11 }
  0x51   :  { %476 = vmatpush.msrb.mxu3 %v465_v12 }
  0x53   :  { %477 = vmatpush.msrb.mxu3 %v464_v13 }
  0x55   :  { %478 = vmatpush.msrb.mxu3 %v463_v14 }
  0x57   :  { %479 = vmatpush.msrb.mxu3 %v462_v15 }
  0x59   :  { %480 = vmatpush.msrb.mxu3 %v461_v16 }
  0x5b   :  { %481 = vmatpush.msrb.mxu3 %v460_v17 }
  0xb0   :  { %v130_v50 = vpop.f32.mrf.mxu0 }
  0xb1   :  { %v150_v51 = vpop.f32.mrf.mxu1 }
  0xb2   :  { %v773_v52 = vadd.f32 %v150_v51, %v130_v50  ;;  %v269_v50 = vld [vmem:[#allocation8 + $0x98] sm:$0xff]  ;;  %v268_v51 = vld [vmem:[#allocation8 + $0x90] sm:$0xff] }
  0xb3   :  { %308 = vmatpush.msrb.mxu0 %v269_v50  ;;  %v384_v50 = vld [vmem:[#allocation8 + $0x128] sm:$0xff] }
  0xb4   :  { %v169_v53 = vrot.slane %v773_v52, 4  ;;  %v175_v54 = vmul.f32 %v773_v52, %v773_v52 }
  0xb5   :  { %309 = vmatpush.msrb.mxu0 %v268_v51  ;;  %v383_v51 = vld [vmem:[#allocation8 + $0x120] sm:$0xff] }
  0xb6   :  { %v170_v55 = vadd.f32 %v169_v53, %v773_v52  ;;  %v176_v56 = vrot.slane %v175_v54, 4  ;;  %v267_v53 = vld [vmem:[#allocation8 + $0x88] sm:$0xff] }
  0xb7   :  { %310 = vmatpush.msrb.mxu0 %v267_v53  ;;  %v382_v53 = vld [vmem:[#allocation8 + $0x118] sm:$0xff] }
  0xb8   :  { %v171_v57 = vrot.slane %v170_v55, 2  ;;  %v177_v58 = vadd.f32 %v176_v56, %v175_v54 }
  0xba   :  { %v172_v59 = vadd.f32 %v171_v57, %v170_v55  ;;  %v178_v60 = vrot.slane %v177_v58, 2 }
  0xbc   :  { %v173_v61 = vrot.slane %v172_v59, 1  ;;  %v179_v62 = vadd.f32 %v178_v60, %v177_v58 }
  0xbe   :  { %v180_v63 = vrot.slane %v179_v62, 1  ;;  %v174_v0 = vadd.f32 %v173_v61, %v172_v59 }
  0xc0   :  { %v181_v1 = vadd.f32 %v180_v63, %v179_v62 }
  0xc2   :  { %v183_v2 = vsel %vm182_vm0, %v174_v0, %v181_v1 }
  0xc3   :  { %200 = vmatmul.f32.vlgmr.msra.gmra.mxu2 %v183_v2 }
 0x146   :  { %v201_v18 = vpop.f32.mrf.mxu2 }
 0x147   :  { %v204_v20 = vmul.f32 %v201_v18, %v201_v18  ;;  %v210_v38 = vperm.slane %v201_v18, 0 }
 0x149   :  { %v206_v21 = vrot.slane %v204_v20, 7  ;;  %v211_v41 = vsub.f32 %v773_v52, %v210_v38  ;;  %v266_v52 = vld [vmem:[#allocation8 + $0x80] sm:$0xff] }
 0x14a   :  { %311 = vmatpush.msrb.mxu0 %v266_v52  ;;  %v381_v52 = vld [vmem:[#allocation8 + $0x110] sm:$0xff] }
 0x14b   :  { %v208_v24 = vsub.f32 %v201_v18, %v206_v21  ;;  %v344_v18 = vld [vmem:[#allocation7 + $0x90] sm:$0xff]  ;;  %v342_v21 = vld [vmem:[#allocation7 + $0x80] sm:$0xff] }
 0x14c   :  { %371 = vmatpush.msrb.mxu1 %v344_v18  ;;  %v459_v18 = vld [vmem:[#allocation7 + $0x120] sm:$0xff] }
 0x14d   :  { %v209_v26 = vmax.f32 %v208_v24, 0.0  ;;  %v394_v24 = vld [vmem:[#allocation8 + $0x178] sm:$0xff]  ;;  %482 = vmatpush.msrb.mxu3 %v459_v18 }
 0x14e   :  { %372 = vmatpush.msrb.mxu1 %v343_v19  ;;  %409 = vmatpush.msrb.mxu2 %v394_v24  ;;  %v458_v19 = vld [vmem:[#allocation7 + $0x118] sm:$0xff] }
 0x14f   :  { %v212_v28 = vadd.f32 1e-05, %v209_v26  ;;  %483 = vmatpush.msrb.mxu3 %v458_v19 }
 0x150   :  { %373 = vmatpush.msrb.mxu1 %v342_v21  ;;  %410 = vmatpush.msrb.mxu2 %v393_v25  ;;  %v456_v21 = vld [vmem:[#allocation7 + $0x108] sm:$0xff] }
 0x151   :  { %593 = vrsqrt.f32 %v212_v28  ;;  %vm219_vm2 = vweird.f32 %v212_v28 }
 0x152   :  { %411 = vmatpush.msrb.mxu2 %v392_v27  ;;  %v506_v27 = vld [vmem:[#allocation8 + $0x1f0] sm:$0xff] }
 0x154   :  { %412 = vmatpush.msrb.mxu2 %v391_v29  ;;  %v505_v29 = vld [vmem:[#allocation8 + $0x1e8] sm:$0xff] }
 0x156   :  { %413 = vmatpush.msrb.mxu2 %v390_v31  ;;  %v504_v31 = vld [vmem:[#allocation8 + $0x1e0] sm:$0xff] }
 0x157   :  { %v594_v33 = vpop.eup %593 }
 0x158   :  { %v214_v34 = vmul.f32 %v594_v33, %v212_v28  ;;  %vm220_vm1 = vweird.f32 %v594_v33  ;;  %414 = vmatpush.msrb.mxu2 %v389_v32 }
 0x159   :  { %vm221_vm3 = vmor %vm219_vm2, %vm220_vm1 }
 0x15a   :  { %v215_v35 = vmul.f32 %v594_v33, %v214_v34  ;;  %v387_v34 = vld [vmem:[#allocation8 + $0x140] sm:$0xff] }
 0x15c   :  { %v216_v36 = vmul.f32 0.5, %v215_v35 }
 0x15e   :  { %v217_v37 = vsub.f32 1.5, %v216_v36 }
 0x160   :  { %v218_v39 = vmul.f32 %v594_v33, %v217_v37 }
 0x162   :  { %v222_v40 = vsel %vm221_vm3, %v594_v33, %v218_v39  ;;  %v388_v33 = vld [vmem:[#allocation8 + $0x148] sm:$0xff] }
 0x163   :  { %v223_v42 = vperm.slane %v222_v40, 1  ;;  %415 = vmatpush.msrb.mxu2 %v388_v33  ;;  %v503_v33 = vld [vmem:[#allocation8 + $0x1d8] sm:$0xff] }
 0x165   :  { %v224_v43 = vmul.f32 %v223_v42, %v211_v41  ;;  %416 = vmatpush.msrb.mxu2 %v387_v34  ;;  %v502_v34 = vld [vmem:[#allocation8 + $0x1d0] sm:$0xff] }
 0x167   :  { %vm225_vm4 = vcmp.ge.f32.partialorder %v224_v43, 0.0  ;;  %v226_v44 = vmul.f32 0.2, %v224_v43  ;;  %417 = vmatpush.msrb.mxu2 %v386_v48 }
 0x169   :  { %v227_v45 = vsel %vm225_vm4, %v224_v43, %v226_v44  ;;  %418 = vmatpush.msrb.mxu2 %v385_v49 }
 0x16a   :  { %228 = vst [vmem:[#allocation10] sm:$0xff] %v227_v45  ;;  %261 = vmatmul.f32.vlgmr.msra.gmra.mxu3 %v227_v45 }
 0x16b   :  { %419 = vmatpush.msrb.mxu2 %v384_v50  ;;  %v499_v50 = vld [vmem:[#allocation8 + $0x1b8] sm:$0xff] }
 0x16d   :  { %420 = vmatpush.msrb.mxu2 %v383_v51  ;;  %v498_v51 = vld [vmem:[#allocation8 + $0x1b0] sm:$0xff] }
 0x16f   :  { %421 = vmatpush.msrb.mxu2 %v382_v53  ;;  %v497_v53 = vld [vmem:[#allocation8 + $0x1a8] sm:$0xff] }
 0x171   :  { %422 = vmatpush.msrb.mxu2 %v381_v52  ;;  %v496_v52 = vld [vmem:[#allocation8 + $0x1a0] sm:$0xff] }
 0x1ed   :  { %v781_v54 = vpop.f32.mrf.mxu3 }
 0x1ee   :  { %v282_v55 = vrot.slane %v781_v54, 4  ;;  %v288_v56 = vmul.f32 %v781_v54, %v781_v54 }
 0x1f0   :  { %v283_v57 = vadd.f32 %v282_v55, %v781_v54  ;;  %v289_v58 = vrot.slane %v288_v56, 4  ;;  %v380_v55 = vld [vmem:[#allocation8 + $0x108] sm:$0xff] }
 0x1f1   :  { %423 = vmatpush.msrb.mxu2 %v380_v55  ;;  %v495_v55 = vld [vmem:[#allocation8 + $0x198] sm:$0xff] }
 0x1f2   :  { %v284_v59 = vrot.slane %v283_v57, 2  ;;  %v290_v60 = vadd.f32 %v289_v58, %v288_v56 }
 0x1f4   :  { %v285_v61 = vadd.f32 %v284_v59, %v283_v57  ;;  %v291_v62 = vrot.slane %v290_v60, 2 }
 0x1f6   :  { %v286_v63 = vrot.slane %v285_v61, 1  ;;  %v292_v0 = vadd.f32 %v291_v62, %v290_v60 }
 0x1f8   :  { %v293_v1 = vrot.slane %v292_v0, 1  ;;  %v287_v2 = vadd.f32 %v286_v63, %v285_v61 }
 0x1fa   :  { %v294_v3 = vadd.f32 %v293_v1, %v292_v0 }
 0x1fc   :  { %v295_v4 = vsel %vm182_vm0, %v287_v2, %v294_v3 }
 0x1fd   :  { %312 = vmatmul.f32.vlgmr.msrb.gmra.mxu0 %v295_v4 }
 0x27a   :  { %v313_v20 = vpop.f32.mrf.mxu0 }
 0x27b   :  { %v316_v22 = vmul.f32 %v313_v20, %v313_v20  ;;  %v322_v40 = vperm.slane %v313_v20, 0 }
 0x27d   :  { %v318_v23 = vrot.slane %v316_v22, 7  ;;  %v323_v43 = vsub.f32 %v781_v54, %v322_v40  ;;  %v379_v54 = vld [vmem:[#allocation8 + $0x100] sm:$0xff] }
 0x27e   :  { %424 = vmatpush.msrb.mxu2 %v379_v54  ;;  %v494_v54 = vld [vmem:[#allocation8 + $0x190] sm:$0xff] }
 0x27f   :  { %v320_v26 = vsub.f32 %v313_v20, %v318_v23  ;;  %v457_v20 = vld [vmem:[#allocation7 + $0x110] sm:$0xff]  ;;  %v455_v23 = vld [vmem:[#allocation7 + $0x100] sm:$0xff] }
 0x280   :  { %484 = vmatpush.msrb.mxu3 %v457_v20 }
 0x281   :  { %v321_v28 = vmax.f32 %v320_v26, 0.0  ;;  %v507_v26 = vld [vmem:[#allocation8 + $0x1f8] sm:$0xff] }
 0x282   :  { %485 = vmatpush.msrb.mxu3 %v456_v21  ;;  %522 = vmatpush.msra.mxu0 %v507_v26 }
 0x283   :  { %v324_v30 = vadd.f32 1e-05, %v321_v28 }
 0x284   :  { %486 = vmatpush.msrb.mxu3 %v455_v23  ;;  %523 = vmatpush.msra.mxu0 %v506_v27 }
 0x285   :  { %595 = vrsqrt.f32 %v324_v30  ;;  %vm331_vm6 = vweird.f32 %v324_v30 }
 0x286   :  { %524 = vmatpush.msra.mxu0 %v505_v29 }
 0x288   :  { %525 = vmatpush.msra.mxu0 %v504_v31 }
 0x28a   :  { %526 = vmatpush.msra.mxu0 %v503_v33 }
 0x28b   :  { %v596_v35 = vpop.eup %595 }
 0x28c   :  { %v326_v36 = vmul.f32 %v596_v35, %v324_v30  ;;  %vm332_vm5 = vweird.f32 %v596_v35  ;;  %527 = vmatpush.msra.mxu0 %v502_v34 }
 0x28d   :  { %vm333_vm7 = vmor %vm331_vm6, %vm332_vm5 }
 0x28e   :  { %v327_v37 = vmul.f32 %v596_v35, %v326_v36  ;;  %v500_v36 = vld [vmem:[#allocation8 + $0x1c0] sm:$0xff] }
 0x290   :  { %v328_v38 = vmul.f32 0.5, %v327_v37 }
 0x292   :  { %v329_v39 = vsub.f32 1.5, %v328_v38 }
 0x294   :  { %v330_v41 = vmul.f32 %v596_v35, %v329_v39 }
 0x296   :  { %v334_v42 = vsel %vm333_vm7, %v596_v35, %v330_v41  ;;  %v501_v35 = vld [vmem:[#allocation8 + $0x1c8] sm:$0xff] }
 0x297   :  { %v335_v44 = vperm.slane %v334_v42, 1  ;;  %528 = vmatpush.msra.mxu0 %v501_v35 }
 0x299   :  { %v336_v45 = vmul.f32 %v335_v44, %v323_v43  ;;  %529 = vmatpush.msra.mxu0 %v500_v36 }
 0x29b   :  { %vm337_vm8 = vcmp.ge.f32.partialorder %v336_v45, 0.0  ;;  %v338_v46 = vmul.f32 0.2, %v336_v45  ;;  %530 = vmatpush.msra.mxu0 %v499_v50 }
 0x29d   :  { %v339_v47 = vsel %vm337_vm8, %v336_v45, %v338_v46  ;;  %531 = vmatpush.msra.mxu0 %v498_v51 }
 0x29e   :  { %340 = vst [vmem:[#allocation10 + $0x8] sm:$0xff] %v339_v47  ;;  %374 = vmatmul.f32.vlgmr.msrb.gmra.mxu1 %v339_v47 }
 0x29f   :  { %532 = vmatpush.msra.mxu0 %v497_v53 }
 0x2a1   :  { %533 = vmatpush.msra.mxu0 %v496_v52 }
 0x2a3   :  { %534 = vmatpush.msra.mxu0 %v495_v55 }
 0x2a5   :  { %535 = vmatpush.msra.mxu0 %v494_v54 }
 0x31b   :  { %v789_v56 = vpop.f32.mrf.mxu1 }
 0x31c   :  { %v395_v57 = vrot.slane %v789_v56, 4  ;;  %v401_v58 = vmul.f32 %v789_v56, %v789_v56 }
 0x31e   :  { %v396_v59 = vadd.f32 %v395_v57, %v789_v56  ;;  %v402_v60 = vrot.slane %v401_v58, 4  ;;  %v492_v57 = vld [vmem:[#allocation8 + $0x180] sm:$0xff] }
 0x320   :  { %v397_v61 = vrot.slane %v396_v59, 2  ;;  %v403_v62 = vadd.f32 %v402_v60, %v401_v58 }
 0x322   :  { %v398_v63 = vadd.f32 %v397_v61, %v396_v59  ;;  %v404_v0 = vrot.slane %v403_v62, 2 }
 0x324   :  { %v399_v1 = vrot.slane %v398_v63, 1  ;;  %v405_v2 = vadd.f32 %v404_v0, %v403_v62 }
 0x326   :  { %v406_v3 = vrot.slane %v405_v2, 1  ;;  %v400_v4 = vadd.f32 %v399_v1, %v398_v63 }
 0x328   :  { %v407_v5 = vadd.f32 %v406_v3, %v405_v2 }
 0x32a   :  { %v408_v6 = vsel %vm182_vm0, %v400_v4, %v407_v5 }
 0x32b   :  { %425 = vmatmul.f32.vlgmr.msrb.gmra.mxu2 %v408_v6 }
 0x3ae   :  { %v426_v22 = vpop.f32.mrf.mxu2 }
 0x3af   :  { %v429_v24 = vmul.f32 %v426_v22, %v426_v22  ;;  %v435_v42 = vperm.slane %v426_v22, 0 }
 0x3b1   :  { %v431_v25 = vrot.slane %v429_v24, 7  ;;  %v436_v45 = vsub.f32 %v789_v56, %v435_v42  ;;  %v493_v56 = vld [vmem:[#allocation8 + $0x188] sm:$0xff] }
 0x3b2   :  { %536 = vmatpush.msra.mxu0 %v493_v56 }
 0x3b3   :  { %v433_v28 = vsub.f32 %v426_v22, %v431_v25 }
 0x3b4   :  { %537 = vmatpush.msra.mxu0 %v492_v57 }
 0x3b5   :  { %v434_v30 = vmax.f32 %v433_v28, 0.0 }
 0x3b7   :  { %v437_v32 = vadd.f32 1e-05, %v434_v30 }
 0x3b9   :  { %597 = vrsqrt.f32 %v437_v32  ;;  %vm444_vm10 = vweird.f32 %v437_v32 }
 0x3bf   :  { %v598_v37 = vpop.eup %597 }
 0x3c0   :  { %v439_v38 = vmul.f32 %v598_v37, %v437_v32  ;;  %vm445_vm9 = vweird.f32 %v598_v37 }
 0x3c1   :  { %vm446_vm11 = vmor %vm444_vm10, %vm445_vm9 }
 0x3c2   :  { %v440_v39 = vmul.f32 %v598_v37, %v439_v38 }
 0x3c4   :  { %v441_v40 = vmul.f32 0.5, %v440_v39 }
 0x3c6   :  { %v442_v41 = vsub.f32 1.5, %v441_v40 }
 0x3c8   :  { %v443_v43 = vmul.f32 %v598_v37, %v442_v41 }
 0x3ca   :  { %v447_v44 = vsel %vm446_vm11, %v598_v37, %v443_v43 }
 0x3cb   :  { %v448_v46 = vperm.slane %v447_v44, 1 }
 0x3cd   :  { %v449_v47 = vmul.f32 %v448_v46, %v436_v45 }
 0x3cf   :  { %vm450_vm12 = vcmp.ge.f32.partialorder %v449_v47, 0.0  ;;  %v451_v48 = vmul.f32 0.2, %v449_v47 }
 0x3d1   :  { %v452_v49 = vsel %vm450_vm12, %v449_v47, %v451_v48 }
 0x3d2   :  { %453 = vst [vmem:[#allocation10 + $0x10] sm:$0xff] %v452_v49  ;;  %487 = vmatmul.f32.vlgmr.msrb.gmra.mxu3 %v452_v49 }
 0x455   :  { %v488_v58 = vpop.f32.mrf.mxu3 }
 0x456   :  { %v508_v59 = vrot.slane %v488_v58, 4  ;;  %v514_v60 = vmul.f32 %v488_v58, %v488_v58 }
 0x458   :  { %v509_v61 = vadd.f32 %v508_v59, %v488_v58  ;;  %v515_v62 = vrot.slane %v514_v60, 4 }
 0x45a   :  { %v510_v63 = vrot.slane %v509_v61, 2  ;;  %v516_v0 = vadd.f32 %v515_v62, %v514_v60 }
 0x45c   :  { %v511_v1 = vadd.f32 %v510_v63, %v509_v61  ;;  %v517_v2 = vrot.slane %v516_v0, 2 }
 0x45e   :  { %v512_v3 = vrot.slane %v511_v1, 1  ;;  %v518_v4 = vadd.f32 %v517_v2, %v516_v0 }
 0x460   :  { %v519_v5 = vrot.slane %v518_v4, 1  ;;  %v513_v6 = vadd.f32 %v512_v3, %v511_v1 }
 0x462   :  { %v520_v7 = vadd.f32 %v519_v5, %v518_v4 }
 0x464   :  { %v521_v8 = vsel %vm182_vm0, %v513_v6, %v520_v7 }
 0x465   :  { %538 = vmatmul.f32.vlgmr.msra.gmra.mxu0 %v521_v8 }
 0x4e2   :  { %v539_v9 = vpop.f32.mrf.mxu0 }
 0x4e3   :  { %v542_v10 = vmul.f32 %v539_v9, %v539_v9  ;;  %v548_v20 = vperm.slane %v539_v9, 0 }
 0x4e5   :  { %v544_v11 = vrot.slane %v542_v10, 7  ;;  %v549_v23 = vsub.f32 %v488_v58, %v548_v20 }
 0x4e7   :  { %v546_v12 = vsub.f32 %v539_v9, %v544_v11 }
 0x4e9   :  { %v547_v13 = vmax.f32 %v546_v12, 0.0 }
 0x4eb   :  { %v550_v14 = vadd.f32 1e-05, %v547_v13 }
 0x4ed   :  { %599 = vrsqrt.f32 %v550_v14  ;;  %vm557_vm14 = vweird.f32 %v550_v14 }
 0x4f3   :  { %v600_v15 = vpop.eup %599 }
 0x4f4   :  { %v552_v16 = vmul.f32 %v600_v15, %v550_v14  ;;  %vm558_vm13 = vweird.f32 %v600_v15 }
 0x4f5   :  { %vm559_vm15 = vmor %vm557_vm14, %vm558_vm13 }
 0x4f6   :  { %v553_v17 = vmul.f32 %v600_v15, %v552_v16 }
 0x4f8   :  { %v554_v18 = vmul.f32 0.5, %v553_v17 }
 0x4fa   :  { %v555_v19 = vsub.f32 1.5, %v554_v18 }
 0x4fc   :  { %v556_v21 = vmul.f32 %v600_v15, %v555_v19 }
 0x4fe   :  { %v560_v22 = vsel %vm559_vm15, %v600_v15, %v556_v21 }
 0x4ff   :  { %v561_v24 = vperm.slane %v560_v22, 1 }
 0x501   :  { %v562_v25 = vmul.f32 %v561_v24, %v549_v23 }
 0x503   :  { %vm563_vm0 = vcmp.ge.f32.partialorder %v562_v25, 0.0  ;;  %v564_v26 = vmul.f32 0.2, %v562_v25 }
 0x505   :  { %v565_v27 = vsel %vm563_vm0, %v562_v25, %v564_v26 }
 0x506   :  { %566 = vst [vmem:[#allocation10 + $0x18] sm:$0xff] %v565_v27 }
 0x507   :  { %577 = dma.vmem_to_hbm [thread:$0]  %s573_s3, 512, %s575_s11, [#allocation4]  }
 0x508   :  { %727 = dma.done.wait [#allocation4], 512  }
 0x509   :  { %728 = vsyncadd [#allocation4], 4294966784 }
 0x50a   :  { %582 = vsyncpa [#allocation3], 1 }
 0x50b   :  { %583 = vsyncpa [#allocation6], 1 }
 0x50c   :  { %584 = vsyncpa [#allocation9], 1 }
 0x50d   :  { %585 = vsyncpa [#allocation4], 1 }

</bundles_post_ra>
